<compile_context>
chip_gen: v7x
topology: tpu7x:2x2x1
jax: 0.10.0
libtpu: 0.0.40
codegen_flags: <defaults>
</compile_context>

<pallas_src>
import functools

import numpy as np
import jax
import jax.numpy as jnp
from jax.experimental import pallas as pl
from jax.experimental.pallas import tpu as pltpu


def _round_up(x, m):
    return (x + m - 1) // m * m


def _choose_tiles(n, tile_m=512, tile_k=2048):
    """Pick (tile_m, tile_k, n_pad): tiles are multiples of 128, divide n_pad,
    tile_k is wide (DMA bursts / fewer reduction steps), and tile_m leaves
    >= 2 row blocks whenever possible (v7x megacore)."""
    n128 = _round_up(max(n, 1), 128)
    tile_k = max(128, min(tile_k // 128 * 128, n128))
    n_pad = _round_up(n, tile_k)

    cap = max(128, min(tile_m // 128 * 128, n_pad))
    if n_pad >= 256:
        cap = min(cap, max(128, (n_pad // 2) // 128 * 128))
    tm = 128
    t = cap
    while t >= 128:
        if n_pad % t == 0:
            tm = t
            break
        t -= 128
    return tm, tile_k, n_pad


def _gcn_kernel(*refs, has_w, has_w2, apply_relu):
    """out[i] = act( (sum_k adj[i,k] @ feat[k]) [@ W] + b ) [@ W2]."""
    it = iter(refs)
    adj_ref = next(it)
    feat_ref = next(it)
    w_ref = next(it) if has_w else None
    b_ref = next(it)
    w2_ref = next(it) if has_w2 else None
    out_ref = next(it)
    acc_ref = next(it)

    k = pl.program_id(1)

    @pl.when(k == 0)
    def _():
        acc_ref[...] = jnp.zeros_like(acc_ref)

    # bf16 x bf16 -> f32 accumulation on the MXU (streamed operands).
    acc_ref[...] += jnp.dot(adj_ref[...], feat_ref[...],
                            preferred_element_type=jnp.float32)

    @pl.when(k == pl.num_programs(1) - 1)
    def _():
        y = acc_ref[...]
        if has_w:
            y = jnp.dot(y, w_ref[...].astype(jnp.float32),
                        preferred_element_type=jnp.float32)
        y = y + b_ref[...]
        if apply_relu:
            y = jnp.maximum(y, 0.0)
        if has_w2:
            w2 = w2_ref[...]
            y = jnp.dot(y.astype(w2.dtype), w2,
                        preferred_element_type=jnp.float32)
        out_ref[...] = y.astype(out_ref.dtype)


def gcn_conv_pallas(adj_p, feat, w, b, w2=None, *, apply_relu, out_dtype,
                    tile_m, tile_k, compute_dtype=jnp.bfloat16):
    """act(adj_p @ feat [@ w] + b) [@ w2], tiled over a (row, reduction) grid.

    adj_p must already be padded to (n_pad, n_pad) and cast to compute_dtype.
    """
    n_pad = adj_p.shape[0]
    assert n_pad % tile_m == 0 and n_pad % tile_k == 0

    # Pre-project (project-then-aggregate) when the features are wider than the
    # projection output; the post-projection is then dropped entirely
    # (no identity matmul, no resident W DMA).
    if w is not None and feat.shape[1] > w.shape[1]:
        feat = jnp.dot(feat.astype(jnp.float32), w.astype(jnp.float32),
                       preferred_element_type=jnp.float32)
        w = None

    feat = feat.astype(compute_dtype)
    if feat.shape[0] != n_pad:
        feat = jnp.pad(feat, ((0, n_pad - feat.shape[0]), (0, 0)))
    f = feat.shape[1]

    mid_w = w.shape[1] if w is not None else f
    c_out = w2.shape[1] if w2 is not None else mid_w
    b = jnp.reshape(b, (1, -1)).astype(jnp.float32)
    assert b.shape[1] == mid_w

    in_specs = [
        pl.BlockSpec((tile_m, tile_k), lambda i, k: (i, k)),   # adj tile
        pl.BlockSpec((tile_k, f), lambda i, k: (k, 0)),        # feature tile
    ]
    operands = [adj_p, feat]
    if w is not None:
        in_specs.append(pl.BlockSpec(w.shape, lambda i, k: (0, 0)))
        operands.append(w.astype(compute_dtype))               # resident, bf16
    in_specs.append(pl.BlockSpec((1, mid_w), lambda i, k: (0, 0)))
    operands.append(b)                                         # resident, f32
    if w2 is not None:
        in_specs.append(pl.BlockSpec(w2.shape, lambda i, k: (0, 0)))
        operands.append(w2.astype(compute_dtype))              # resident, bf16

    grid = (n_pad // tile_m, n_pad // tile_k)

    itemsize = np.dtype(compute_dtype).itemsize
    out_itemsize = np.dtype(out_dtype).itemsize

    flops = 2 * n_pad * n_pad * f
    if w is not None:
        flops += 2 * n_pad * f * w.shape[1]
    if w2 is not None:
        flops += 2 * n_pad * w2.shape[0] * w2.shape[1]
    bytes_accessed = (n_pad * n_pad * itemsize                 # adj stream
                      + grid[0] * n_pad * f * itemsize         # re-streamed feat
                      + n_pad * c_out * out_itemsize)          # output writeback

    vmem_need = (2 * tile_m * tile_k * itemsize                # adj double buffer
                 + 2 * tile_k * f * itemsize                   # feat double buffer
                 + 2 * tile_m * max(c_out, 128) * out_itemsize # out double buffer
                 + tile_m * max(f, 128) * 4                    # f32 accumulator
                 + (2 << 20))                                  # weights/bias/slack
    vmem_limit = int(min(max(2 * vmem_need, 32 << 20), 48 << 20))

    return pl.pallas_call(
        functools.partial(_gcn_kernel, has_w=w is not None,
                          has_w2=w2 is not None, apply_relu=apply_relu),
        out_shape=jax.ShapeDtypeStruct((n_pad, c_out), out_dtype),
        grid_spec=pltpu.PrefetchScalarGridSpec(
            num_scalar_prefetch=0,
            grid=grid,
            in_specs=in_specs,
            out_specs=pl.BlockSpec((tile_m, c_out), lambda i, k: (i, 0)),
            scratch_shapes=[pltpu.VMEM((tile_m, f), jnp.float32)],
        ),
        compiler_params=pltpu.CompilerParams(
            dimension_semantics=("parallel", "arbitrary"),
            vmem_limit_bytes=vmem_limit),
        cost_estimate=pl.CostEstimate(flops=int(flops), transcendentals=0,
                                      bytes_accessed=int(bytes_accessed)),
    )(*operands)


def vgae_encoder_pallas(adj, x, w1, b1, wmu, bmu, wls, bls, *,
                        tile_m=512, tile_k=2048, compute_dtype=jnp.bfloat16):
    """VariationalGCNEncoder forward: returns (mu, logstd)."""
    n = adj.shape[0]
    oc = wmu.shape[1]
    tm, tk, n_pad = _choose_tiles(n, tile_m, tile_k)

    # A_hat is padded & cast exactly once and shared by both layers.
    adj_p = jnp.pad(adj.astype(compute_dtype), ((0, n_pad - n), (0, n_pad - n)))

    # mu / logstd projections fused -> A_hat is streamed only twice total, and
    # the fused projection is folded into layer 1's finalize so the inter-layer
    # intermediate is a narrow bf16 (n_pad, 2*oc) array handed to layer 2
    # with no wrapper-side slice/cast/pad round trip.
    w_cat = jnp.concatenate([wmu, wls], axis=1)
    b_cat = jnp.concatenate([jnp.reshape(bmu, (1, -1)),
                             jnp.reshape(bls, (1, -1))], axis=1)

    g = gcn_conv_pallas(adj_p, x, w1, b1, w2=w_cat, apply_relu=True,
                        out_dtype=compute_dtype, tile_m=tm, tile_k=tk,
                        compute_dtype=compute_dtype)
    out = gcn_conv_pallas(adj_p, g, None, b_cat, apply_relu=False,
                          out_dtype=jnp.float32, tile_m=tm, tile_k=tk,
                          compute_dtype=compute_dtype)
    return out[:n, :oc], out[:n, oc:2 * oc]


def build_normalized_adjacency(edge_index, num_nodes):
    """Dense GCN-normalized adjacency with self-loops (plain-JAX glue).

    Assumes edge_index contains no pre-existing self-loops (PyG's
    add_remaining_self_loops semantics would differ if it did)."""
    src = jnp.concatenate([edge_index[0], jnp.arange(num_nodes, dtype=edge_index.dtype)])
    dst = jnp.concatenate([edge_index[1], jnp.arange(num_nodes, dtype=edge_index.dtype)])
    deg = jnp.zeros((num_nodes,), jnp.float32).at[dst].add(1.0)
    dinv = jnp.where(deg > 0, jax.lax.rsqrt(deg), 0.0)
    norm = dinv[src] * dinv[dst]
    adj = jnp.zeros((num_nodes, num_nodes), jnp.float32).at[dst, src].add(norm)
    return adj


def init_params(key, in_channels, out_channels):
    """Deterministic glorot-style init matching GCNConv parameter shapes."""
    hid = 2 * out_channels
    k1, k2, k3 = jax.random.split(key, 3)

    def glorot(k, fan_in, fan_out):
        s = jnp.sqrt(6.0 / (fan_in + fan_out))
        return jax.random.uniform(k, (fan_in, fan_out), jnp.float32, -s, s)

    w1 = glorot(k1, in_channels, hid)
    wmu = glorot(k2, hid, out_channels)
    wls = glorot(k3, hid, out_channels)
    b1 = jnp.zeros((1, hid), jnp.float32)
    bmu = jnp.zeros((1, out_channels), jnp.float32)
    bls = jnp.zeros((1, out_channels), jnp.float32)
    return w1, b1, wmu, bmu, wls, bls


def reference_forward(adj, x, w1, b1, wmu, bmu, wls, bls,
                      compute_dtype=jnp.bfloat16):
    """Plain-JAX reference mirroring the kernel's bf16 quantization points."""
    q = lambda a: a.astype(compute_dtype).astype(jnp.float32)
    dot = functools.partial(jnp.dot, precision=jax.lax.Precision.HIGHEST)
    oc = wmu.shape[1]
    w_cat = jnp.concatenate([wmu, wls], axis=1)
    b_cat = jnp.concatenate([jnp.reshape(bmu, (1, -1)),
                             jnp.reshape(bls, (1, -1))], axis=1)
    h = jnp.maximum(dot(dot(q(adj), q(x)), q(w1)) + jnp.reshape(b1, (1, -1)), 0.0)
    g = dot(q(h), q(w_cat))          # layer-1 fused projection (bf16 operands)
    out = dot(q(adj), q(g)) + b_cat  # layer-2 aggregation + bias
    return out[:, :oc], out[:, oc:2 * oc]


if __name__ == "__main__":
    key = jax.random.PRNGKey(0)
    num_nodes = 256
    in_channels = 16
    out_channels = 8
    num_edges = 512

    k_x, k_e, k_p = jax.random.split(key, 3)
    x = jax.random.normal(k_x, (num_nodes, in_channels), jnp.float32)
    edge_index = jax.random.randint(k_e, (2, num_edges), 0, num_nodes, jnp.int32)

    adj = build_normalized_adjacency(edge_index, num_nodes)
    w1, b1, wmu, bmu, wls, bls = init_params(k_p, in_channels, out_channels)

    # At this demo size the tiles clamp to tile_m=128, tile_k=256 -> a (2, 1)
    # grid per layer (>= 2 row blocks for megacore sharding).
    encoder = jax.jit(vgae_encoder_pallas)
    mu, logstd = encoder(adj, x, w1, b1, wmu, bmu, wls, bls)
    jax.block_until_ready((mu, logstd))

    mu_ref, logstd_ref = reference_forward(adj, x, w1, b1, wmu, bmu, wls, bls)
    assert mu.shape == (num_nodes, out_channels)
    assert logstd.shape == (num_nodes, out_channels)
    # Streamed operands / resident weights are bf16 (f32 accumulation).
    assert jnp.allclose(mu, mu_ref, atol=1e-2, rtol=1e-2)
    assert jnp.allclose(logstd, logstd_ref, atol=1e-2, rtol=1e-2)

    print("KERNEL_OK")
</pallas_src>

<mosaic_0001>
module attributes {stable_mosaic.version = 11 : i64} {
  func.func @_gcn_kernel(%arg0: i32, %arg1: i32, %arg2: memref<128x256xbf16, #tpu.memory_space<vmem>>, %arg3: memref<256x16xbf16, #tpu.memory_space<vmem>>, %arg4: memref<16x16xbf16, #tpu.memory_space<vmem>>, %arg5: memref<1x16xf32, #tpu.memory_space<vmem>>, %arg6: memref<16x16xbf16, #tpu.memory_space<vmem>>, %arg7: memref<128x16xbf16, #tpu.memory_space<vmem>>, %arg8: memref<128x16xf32, #tpu.memory_space<vmem>>) attributes {dimension_semantics = [#tpu.dimension_semantics<parallel>, #tpu.dimension_semantics<arbitrary>], iteration_bounds = array<i64: 2, 1>, scalar_prefetch = 0 : i64, scratch_operands = 1 : i64, tpu.core_type = #tpu.core_type<tc>, window_params = [{transform_indices = @transform_0, window_bounds = array<i64: 128, 256>}, {transform_indices = @transform_1, window_bounds = array<i64: 256, 16>}, {pipeline_mode = #tpu.pipeline_mode<synchronous>, transform_indices = @transform_2, window_bounds = array<i64: 16, 16>}, {pipeline_mode = #tpu.pipeline_mode<synchronous>, transform_indices = @transform_3, window_bounds = array<i64: 1, 16>}, {pipeline_mode = #tpu.pipeline_mode<synchronous>, transform_indices = @transform_4, window_bounds = array<i64: 16, 16>}, {transform_indices = @transform_5, window_bounds = array<i64: 128, 16>}]} {
    %c0_i32 = arith.constant 0 : i32
    %0 = arith.cmpi eq, %arg1, %c0_i32 : i32
    %1 = arith.extui %0 : i1 to i32
    %c0_i32_0 = arith.constant 0 : i32
    %2 = arith.cmpi ne, %1, %c0_i32_0 : i32
    scf.if %2 {
      %cst_10 = arith.constant 0.000000e+00 : f32
      %12 = vector.broadcast %cst_10 : f32 to vector<128x16xf32>
      %c0_11 = arith.constant 0 : index
      %c0_12 = arith.constant 0 : index
      %13 = vector.load %arg8[%c0_11, %c0_12] : memref<128x16xf32, #tpu.memory_space<vmem>>, vector<128x16xf32>
      tpu.vector_store %arg8[%c0_11, %c0_12], %12 {strides = array<i32>} : memref<128x16xf32, #tpu.memory_space<vmem>>, vector<128x16xf32>,
    } else {
    }
    %c0 = arith.constant 0 : index
    %c0_1 = arith.constant 0 : index
    %3 = vector.load %arg8[%c0, %c0_1] : memref<128x16xf32, #tpu.memory_space<vmem>>, vector<128x16xf32>
    %c0_2 = arith.constant 0 : index
    %c0_3 = arith.constant 0 : index
    %4 = vector.load %arg2[%c0_2, %c0_3] : memref<128x256xbf16, #tpu.memory_space<vmem>>, vector<128x256xbf16>
    %c0_4 = arith.constant 0 : index
    %c0_5 = arith.constant 0 : index
    %5 = vector.load %arg3[%c0_4, %c0_5] : memref<256x16xbf16, #tpu.memory_space<vmem>>, vector<256x16xbf16>
    %cst = arith.constant dense<0.000000e+00> : vector<128x16xf32>
    %6 = tpu.matmul %4, %5, %cst {dimension_numbers = #tpu.dot_dimension_numbers<[1], [0], [0], [1], [0, 0, 1, 1], [], []>} : vector<128x256xbf16>, vector<256x16xbf16>, vector<128x16xf32> -> vector<128x16xf32>
    %7 = arith.addf %3, %6 : vector<128x16xf32>
    %c0_6 = arith.constant 0 : index
    %c0_7 = arith.constant 0 : index
    %8 = vector.load %arg8[%c0_6, %c0_7] : memref<128x16xf32, #tpu.memory_space<vmem>>, vector<128x16xf32>
    tpu.vector_store %arg8[%c0_6, %c0_7], %7 {strides = array<i32>} : memref<128x16xf32, #tpu.memory_space<vmem>>, vector<128x16xf32>,
    %c0_i32_8 = arith.constant 0 : i32
    %9 = arith.cmpi eq, %arg1, %c0_i32_8 : i32
    %10 = arith.extui %9 : i1 to i32
    %c0_i32_9 = arith.constant 0 : i32
    %11 = arith.cmpi ne, %10, %c0_i32_9 : i32
    scf.if %11 {
      %c0_10 = arith.constant 0 : index
      %c0_11 = arith.constant 0 : index
      %12 = vector.load %arg8[%c0_10, %c0_11] : memref<128x16xf32, #tpu.memory_space<vmem>>, vector<128x16xf32>
      %c0_12 = arith.constant 0 : index
      %c0_13 = arith.constant 0 : index
      %13 = vector.load %arg4[%c0_12, %c0_13] : memref<16x16xbf16, #tpu.memory_space<vmem>>, vector<16x16xbf16>
      %14 = arith.extf %13 : vector<16x16xbf16> to vector<16x16xf32>
      %cst_14 = arith.constant dense<0.000000e+00> : vector<128x16xf32>
      %15 = tpu.matmul %12, %14, %cst_14 {dimension_numbers = #tpu.dot_dimension_numbers<[1], [0], [0], [1], [0, 0, 1, 1], [], []>} : vector<128x16xf32>, vector<16x16xf32>, vector<128x16xf32> -> vector<128x16xf32>
      %c0_15 = arith.constant 0 : index
      %c0_16 = arith.constant 0 : index
      %16 = vector.load %arg5[%c0_15, %c0_16] : memref<1x16xf32, #tpu.memory_space<vmem>>, vector<1x16xf32>
      %17 = vector.broadcast %16 : vector<1x16xf32> to vector<128x16xf32>
      %18 = arith.addf %15, %17 : vector<128x16xf32>
      %cst_17 = arith.constant 0.000000e+00 : f32
      %19 = vector.broadcast %cst_17 : f32 to vector<128x16xf32>
      %20 = arith.maximumf %18, %19 : vector<128x16xf32>
      %c0_18 = arith.constant 0 : index
      %c0_19 = arith.constant 0 : index
      %21 = vector.load %arg6[%c0_18, %c0_19] : memref<16x16xbf16, #tpu.memory_space<vmem>>, vector<16x16xbf16>
      %22 = arith.truncf %20 : vector<128x16xf32> to vector<128x16xbf16>
      %cst_20 = arith.constant dense<0.000000e+00> : vector<128x16xf32>
      %23 = tpu.matmul %22, %21, %cst_20 {dimension_numbers = #tpu.dot_dimension_numbers<[1], [0], [0], [1], [0, 0, 1, 1], [], []>} : vector<128x16xbf16>, vector<16x16xbf16>, vector<128x16xf32> -> vector<128x16xf32>
      %24 = arith.truncf %23 : vector<128x16xf32> to vector<128x16xbf16>
      %c0_21 = arith.constant 0 : index
      %c0_22 = arith.constant 0 : index
      %25 = vector.load %arg7[%c0_21, %c0_22] : memref<128x16xbf16, #tpu.memory_space<vmem>>, vector<128x16xbf16>
      tpu.vector_store %arg7[%c0_21, %c0_22], %24 {strides = array<i32>} : memref<128x16xbf16, #tpu.memory_space<vmem>>, vector<128x16xbf16>,
    } else {
    }
    return
  }
  func.func @transform_0(%arg0: i32, %arg1: i32) -> (i32, i32) {
    %c0_i32 = arith.constant 0 : i32
    return %arg0, %arg1 : i32, i32
  }
  func.func @transform_1(%arg0: i32, %arg1: i32) -> (i32, i32) {
    %c0_i32 = arith.constant 0 : i32
    %c0_i32_0 = arith.constant 0 : i32
    return %arg1, %c0_i32 : i32, i32
  }
  func.func @transform_2(%arg0: i32, %arg1: i32) -> (i32, i32) {
    %c0_i32 = arith.constant 0 : i32
    %c0_i32_0 = arith.constant 0 : i32
    %c0_i32_1 = arith.constant 0 : i32
    return %c0_i32, %c0_i32_0 : i32, i32
  }
  func.func @transform_3(%arg0: i32, %arg1: i32) -> (i32, i32) {
    %c0_i32 = arith.constant 0 : i32
    %c0_i32_0 = arith.constant 0 : i32
    %c0_i32_1 = arith.constant 0 : i32
    return %c0_i32, %c0_i32_0 : i32, i32
  }
  func.func @transform_4(%arg0: i32, %arg1: i32) -> (i32, i32) {
    %c0_i32 = arith.constant 0 : i32
    %c0_i32_0 = arith.constant 0 : i32
    %c0_i32_1 = arith.constant 0 : i32
    return %c0_i32, %c0_i32_0 : i32, i32
  }
  func.func @transform_5(%arg0: i32, %arg1: i32) -> (i32, i32) {
    %c0_i32 = arith.constant 0 : i32
    %c0_i32_0 = arith.constant 0 : i32
    return %arg0, %c0_i32 : i32, i32
  }
}

module attributes {stable_mosaic.version = 11 : i64} {
  func.func @_gcn_kernel(%arg0: i32, %arg1: i32, %arg2: memref<128x256xbf16, #tpu.memory_space<vmem>>, %arg3: memref<256x16xbf16, #tpu.memory_space<vmem>>, %arg4: memref<1x16xf32, #tpu.memory_space<vmem>>, %arg5: memref<128x16xf32, #tpu.memory_space<vmem>>, %arg6: memref<128x16xf32, #tpu.memory_space<vmem>>) attributes {dimension_semantics = [#tpu.dimension_semantics<parallel>, #tpu.dimension_semantics<arbitrary>], iteration_bounds = array<i64: 2, 1>, scalar_prefetch = 0 : i64, scratch_operands = 1 : i64, tpu.core_type = #tpu.core_type<tc>, window_params = [{transform_indices = @transform_0, window_bounds = array<i64: 128, 256>}, {transform_indices = @transform_1, window_bounds = array<i64: 256, 16>}, {pipeline_mode = #tpu.pipeline_mode<synchronous>, transform_indices = @transform_2, window_bounds = array<i64: 1, 16>}, {transform_indices = @transform_3, window_bounds = array<i64: 128, 16>}]} {
    %c0_i32 = arith.constant 0 : i32
    %0 = arith.cmpi eq, %arg1, %c0_i32 : i32
    %1 = arith.extui %0 : i1 to i32
    %c0_i32_0 = arith.constant 0 : i32
    %2 = arith.cmpi ne, %1, %c0_i32_0 : i32
    scf.if %2 {
      %cst_10 = arith.constant 0.000000e+00 : f32
      %12 = vector.broadcast %cst_10 : f32 to vector<128x16xf32>
      %c0_11 = arith.constant 0 : index
      %c0_12 = arith.constant 0 : index
      %13 = vector.load %arg6[%c0_11, %c0_12] : memref<128x16xf32, #tpu.memory_space<vmem>>, vector<128x16xf32>
      tpu.vector_store %arg6[%c0_11, %c0_12], %12 {strides = array<i32>} : memref<128x16xf32, #tpu.memory_space<vmem>>, vector<128x16xf32>,
    } else {
    }
    %c0 = arith.constant 0 : index
    %c0_1 = arith.constant 0 : index
    %3 = vector.load %arg6[%c0, %c0_1] : memref<128x16xf32, #tpu.memory_space<vmem>>, vector<128x16xf32>
    %c0_2 = arith.constant 0 : index
    %c0_3 = arith.constant 0 : index
    %4 = vector.load %arg2[%c0_2, %c0_3] : memref<128x256xbf16, #tpu.memory_space<vmem>>, vector<128x256xbf16>
    %c0_4 = arith.constant 0 : index
    %c0_5 = arith.constant 0 : index
    %5 = vector.load %arg3[%c0_4, %c0_5] : memref<256x16xbf16, #tpu.memory_space<vmem>>, vector<256x16xbf16>
    %cst = arith.constant dense<0.000000e+00> : vector<128x16xf32>
    %6 = tpu.matmul %4, %5, %cst {dimension_numbers = #tpu.dot_dimension_numbers<[1], [0], [0], [1], [0, 0, 1, 1], [], []>} : vector<128x256xbf16>, vector<256x16xbf16>, vector<128x16xf32> -> vector<128x16xf32>
    %7 = arith.addf %3, %6 : vector<128x16xf32>
    %c0_6 = arith.constant 0 : index
    %c0_7 = arith.constant 0 : index
    %8 = vector.load %arg6[%c0_6, %c0_7] : memref<128x16xf32, #tpu.memory_space<vmem>>, vector<128x16xf32>
    tpu.vector_store %arg6[%c0_6, %c0_7], %7 {strides = array<i32>} : memref<128x16xf32, #tpu.memory_space<vmem>>, vector<128x16xf32>,
    %c0_i32_8 = arith.constant 0 : i32
    %9 = arith.cmpi eq, %arg1, %c0_i32_8 : i32
    %10 = arith.extui %9 : i1 to i32
    %c0_i32_9 = arith.constant 0 : i32
    %11 = arith.cmpi ne, %10, %c0_i32_9 : i32
    scf.if %11 {
      %c0_10 = arith.constant 0 : index
      %c0_11 = arith.constant 0 : index
      %12 = vector.load %arg6[%c0_10, %c0_11] : memref<128x16xf32, #tpu.memory_space<vmem>>, vector<128x16xf32>
      %c0_12 = arith.constant 0 : index
      %c0_13 = arith.constant 0 : index
      %13 = vector.load %arg4[%c0_12, %c0_13] : memref<1x16xf32, #tpu.memory_space<vmem>>, vector<1x16xf32>
      %14 = vector.broadcast %13 : vector<1x16xf32> to vector<128x16xf32>
      %15 = arith.addf %12, %14 : vector<128x16xf32>
      %c0_14 = arith.constant 0 : index
      %c0_15 = arith.constant 0 : index
      %16 = vector.load %arg5[%c0_14, %c0_15] : memref<128x16xf32, #tpu.memory_space<vmem>>, vector<128x16xf32>
      tpu.vector_store %arg5[%c0_14, %c0_15], %15 {strides = array<i32>} : memref<128x16xf32, #tpu.memory_space<vmem>>, vector<128x16xf32>,
    } else {
    }
    return
  }
  func.func @transform_0(%arg0: i32, %arg1: i32) -> (i32, i32) {
    %c0_i32 = arith.constant 0 : i32
    return %arg0, %arg1 : i32, i32
  }
  func.func @transform_1(%arg0: i32, %arg1: i32) -> (i32, i32) {
    %c0_i32 = arith.constant 0 : i32
    %c0_i32_0 = arith.constant 0 : i32
    return %arg1, %c0_i32 : i32, i32
  }
  func.func @transform_2(%arg0: i32, %arg1: i32) -> (i32, i32) {
    %c0_i32 = arith.constant 0 : i32
    %c0_i32_0 = arith.constant 0 : i32
    %c0_i32_1 = arith.constant 0 : i32
    return %c0_i32, %c0_i32_0 : i32, i32
  }
  func.func @transform_3(%arg0: i32, %arg1: i32) -> (i32, i32) {
    %c0_i32 = arith.constant 0 : i32
    %c0_i32_0 = arith.constant 0 : i32
    return %arg0, %c0_i32 : i32, i32
  }
}

</mosaic_0001>

<bundles_post_ra>
// kernel: vgae_encoder_pallas.3
= control target key start
LH: loop header
LB: loop body
LE: loop exit
PB: predicated region body
PF: predicated region fallthrough
CT: control target
= control target key end

     0   :  { %s1000_s12 = smov 0   ;;  %s1002_s13 = smov 0   ;;  %s1193_s0 = inlined_call_operand.vmem [shape: bf16[256,256], index: 0, kind: input, shape index: {}]   ;;  %s1194_s1 = inlined_call_operand.vmem [shape: bf16[256,16], index: 1, kind: input, shape index: {}]   ;;  %s1195_s2 = inlined_call_operand.vmem [shape: f32[1,16], index: 2, kind: input, shape index: {}]   ;;  %s1196_s3 = inlined_call_operand.vmem [shape: f32[256,16], index: 3, kind: output, shape index: {}]  }
   0x1   :  { %s1004_s14 = smov 0  }
   0x2 LB: > { %s25_s15 = sadd.s32 1, %s973_s13  ;;  %p768_p0 = scmp.ge.s32.totalorder %s977_s14, 1  ;;  %s977_s14 = sphi %s1004_s14, %s13_s14   ;;  %s973_s13 = sphi %s1002_s13, %s1198_s13   ;;  %s969_s12 = sphi %s1000_s12, %s1197_s12  }
   0x3   : > { %p27_p1 = scmp.ge.s32.totalorder %s25_s15, 2  ;;  %p169_p2 = scmp.lt.s32.totalorder %s977_s14, 3 }
   0x5   : > { %s1200_s15 = smov (%p27_p1, %s25_s15), 0  ;;  %p170_p3 = pnand %p768_p0, %p169_p2 }
   0x6   : > { %v915_v0 = vld [vmem:[%s1194_s1 + $0x40] sm:$0xff] (!%p170_p3)   ;;  %s769_s18 = sshll.u32 (!%p170_p3), %s969_s12, 4  ;;  %v917_v2 = vld [vmem:[%s1194_s1 + $0x48] sm:$0xff] (!%p170_p3)   ;;  %v919_v4 = vld [vmem:[%s1194_s1 + $0x50] sm:$0xff] (!%p170_p3)   ;;  %vm232_vm0 = vcmask (!%p170_p3), 130048   ;;  %v979_v32 = vmov (!%p170_p3), 0.0  }
   0x7   : > { %173 = sbr.rel (%p170_p3) target bundleno = 294 (0x126), region = 32  ;;  %v916_v1 = vld [vmem:[%s1194_s1] sm:$0xff] (!%p170_p3)   ;;  %810 = vmatprep.subr.bf16.mxu0 (!%p170_p3), %v915_v0  ;;  %874 = vmatprep.subr.bf16.mxu1 (!%p170_p3), %v915_v0  ;;  %v918_v3 = vld [vmem:[%s1194_s1 + $0x8] sm:$0xff] (!%p170_p3)   ;;  %p205_p4 = scmp.lt.s32.totalorder (!%p170_p3), %s769_s18, 31  ;;  %v920_v5 = vld [vmem:[%s1194_s1 + $0x10] sm:$0xff] (!%p170_p3)   ;;  %233 = vst.msk [vmem:[#allocation2] sm:$0xff] (!%p170_p3), %vm232_vm0, %v979_v32 }
   0x8   : > { %811 = vmatpush3.bf16.msra.mxu0 (!%p170_p3), %v916_v1  ;;  %882 = vmatpush3.bf16.msra.mxu1 (!%p170_p3), %v916_v1  ;;  %v921_v6 = vld [vmem:[%s1194_s1 + $0x58] sm:$0xff] (!%p170_p3)   ;;  %v923_v8 = vld [vmem:[%s1194_s1 + $0x60] sm:$0xff] (!%p170_p3)   ;;  %v925_v10 = vld [vmem:[%s1194_s1 + $0x68] sm:$0xff] (!%p170_p3)   ;;  %234 = vst.msk [vmem:[#allocation2 + $0x8] sm:$0xff] (!%p170_p3), %vm232_vm0, %v979_v32 }
   0x9   : > { %812 = vmatprep.subr.bf16.mxu0 (!%p170_p3), %v917_v2  ;;  %875 = vmatprep.subr.bf16.mxu1 (!%p170_p3), %v917_v2  ;;  %v922_v7 = vld [vmem:[%s1194_s1 + $0x18] sm:$0xff] (!%p170_p3)   ;;  %v924_v9 = vld [vmem:[%s1194_s1 + $0x20] sm:$0xff] (!%p170_p3)   ;;  %v926_v13 = vld [vmem:[%s1194_s1 + $0x28] sm:$0xff] (!%p170_p3)   ;;  %235 = vst.msk [vmem:[#allocation2 + $0x10] sm:$0xff] (!%p170_p3), %vm232_vm0, %v979_v32 }
   0xa   : > { %v927_v14 = vld [vmem:[%s1194_s1 + $0x70] sm:$0xff] (!%p170_p3)   ;;  %v929_v16 = vld [vmem:[%s1194_s1 + $0x78] sm:$0xff] (!%p170_p3)   ;;  %236 = vst.msk [vmem:[#allocation2 + $0x18] sm:$0xff] (!%p170_p3), %vm232_vm0, %v979_v32  ;;  %237 = vst.msk [vmem:[#allocation2 + $0x20] sm:$0xff] (!%p170_p3), %vm232_vm0, %v979_v32 }
   0xb   : > { %v928_v15 = vld [vmem:[%s1194_s1 + $0x30] sm:$0xff] (!%p170_p3)   ;;  %v930_v17 = vld [vmem:[%s1194_s1 + $0x38] sm:$0xff] (!%p170_p3)   ;;  %238 = vst.msk [vmem:[#allocation2 + $0x28] sm:$0xff] (!%p170_p3), %vm232_vm0, %v979_v32  ;;  %239 = vst.msk [vmem:[#allocation2 + $0x30] sm:$0xff] (!%p170_p3), %vm232_vm0, %v979_v32 }
   0xc   : > { %813 = vmatpush3.bf16.msra.mxu0 (!%p170_p3), %v918_v3  ;;  %883 = vmatpush3.bf16.msra.mxu1 (!%p170_p3), %v918_v3  ;;  %240 = vst.msk [vmem:[#allocation2 + $0x38] sm:$0xff] (!%p170_p3), %vm232_vm0, %v979_v32  ;;  %241 = vst.msk [vmem:[#allocation2 + $0x40] sm:$0xff] (!%p170_p3), %vm232_vm0, %v979_v32  ;;  %v1115_v63 = vld [vmem:[%s1195_s2] ss:$0 sm:$0xff] (!%p170_p3) }
   0xd   : > { %814 = vmatprep.subr.bf16.mxu0 (!%p170_p3), %v919_v4  ;;  %876 = vmatprep.subr.bf16.mxu1 (!%p170_p3), %v919_v4  ;;  %242 = vst.msk [vmem:[#allocation2 + $0x48] sm:$0xff] (!%p170_p3), %vm232_vm0, %v979_v32  ;;  %243 = vst.msk [vmem:[#allocation2 + $0x50] sm:$0xff] (!%p170_p3), %vm232_vm0, %v979_v32 }
   0xe   : > { %s1202_s18 = smov (!%p205_p4, %s769_s18), 31  ;;  %244 = vst.msk [vmem:[#allocation2 + $0x58] sm:$0xff] %vm232_vm0, %v979_v32  ;;  %245 = vst.msk [vmem:[#allocation2 + $0x60] sm:$0xff] %vm232_vm0, %v979_v32  ;;  %v249_v35 = vld [vmem:[#allocation2] sm:$0xff] }
   0xf   : > { %s809_s6 = sshll.u32 %s1202_s18, 3  ;;  %246 = vst.msk [vmem:[#allocation2 + $0x68] sm:$0xff] %vm232_vm0, %v979_v32  ;;  %247 = vst.msk [vmem:[#allocation2 + $0x70] sm:$0xff] %vm232_vm0, %v979_v32  ;;  %v250_v43 = vld [vmem:[#allocation2 + $0x8] sm:$0xff] }
  0x10   : > { %815 = vmatpush3.bf16.msra.mxu0 %v920_v5  ;;  %884 = vmatpush3.bf16.msra.mxu1 %v920_v5  ;;  %s1053_s11 = scalar_lea.vmem %s1193_s0, %s809_s6  ;;  %248 = vst.msk [vmem:[#allocation2 + $0x78] sm:$0xff] %vm232_vm0, %v979_v32  ;;  %v251_v55 = vld [vmem:[#allocation2 + $0x10] sm:$0xff]  ;;  %s1122_s8 = scalar_lea.vmem %s1196_s3, %s809_s6 }
  0x11   : > { %816 = vmatprep.subr.bf16.mxu0 %v921_v6  ;;  %877 = vmatprep.subr.bf16.mxu1 %v921_v6  ;;  %v933_v11 = vld [vmem:[%s1053_s11 + $0x4] ss:$8 sps:$4 sm:$0xff]   ;;  %v931_v18 = vld [vmem:[%s1053_s11] ss:$8 sps:$4 sm:$0xff]   ;;  %v937_v20 = vld [vmem:[%s1053_s11 + $0x14] ss:$8 sps:$4 sm:$0xff]  }
  0x12   : > { %v936_v12 = vld [vmem:[%s1053_s11 + $0x44] ss:$8 sps:$4 sm:$0xff]   ;;  %521 = vmatprep.mubr.bf16.mxu0 %v933_v11  ;;  %v934_v19 = vld [vmem:[%s1053_s11 + $0x40] ss:$8 sps:$4 sm:$0xff]   ;;  %v939_v21 = vld [vmem:[%s1053_s11 + $0x54] ss:$8 sps:$4 sm:$0xff]  }
  0x13   : > { %553 = vmatprep.mubr.bf16.mxu1 %v936_v12  ;;  %v941_v22 = vld [vmem:[%s1053_s11 + $0x10] ss:$8 sps:$4 sm:$0xff]   ;;  %v943_v24 = vld [vmem:[%s1053_s11 + $0x24] ss:$8 sps:$4 sm:$0xff]   ;;  %v947_v26 = vld [vmem:[%s1053_s11 + $0x20] ss:$8 sps:$4 sm:$0xff]  }
  0x14   : > { %817 = vmatpush3.bf16.msra.mxu0 %v922_v7  ;;  %885 = vmatpush3.bf16.msra.mxu1 %v922_v7  ;;  %v942_v23 = vld [vmem:[%s1053_s11 + $0x50] ss:$8 sps:$4 sm:$0xff]   ;;  %v945_v25 = vld [vmem:[%s1053_s11 + $0x64] ss:$8 sps:$4 sm:$0xff]   ;;  %v948_v27 = vld [vmem:[%s1053_s11 + $0x60] ss:$8 sps:$4 sm:$0xff]  }
  0x15   : > { %818 = vmatprep.subr.bf16.mxu0 %v923_v8  ;;  %878 = vmatprep.subr.bf16.mxu1 %v923_v8  ;;  %v949_v28 = vld [vmem:[%s1053_s11 + $0x34] ss:$8 sps:$4 sm:$0xff]   ;;  %v953_v30 = vld [vmem:[%s1053_s11 + $0x30] ss:$8 sps:$4 sm:$0xff]   ;;  %v257_v37 = vld [vmem:[#allocation2 + $0x40] sm:$0xff] }
  0x16   : > { %v951_v29 = vld [vmem:[%s1053_s11 + $0x74] ss:$8 sps:$4 sm:$0xff]   ;;  %v954_v31 = vld [vmem:[%s1053_s11 + $0x70] ss:$8 sps:$4 sm:$0xff]   ;;  %v258_v45 = vld [vmem:[#allocation2 + $0x48] sm:$0xff] }
  0x17   : > { %v259_v57 = vld [vmem:[#allocation2 + $0x50] sm:$0xff]  ;;  %v252_v0 = vld [vmem:[#allocation2 + $0x18] sm:$0xff] }
  0x18   : > { %819 = vmatpush3.bf16.msra.mxu0 %v924_v9  ;;  %886 = vmatpush3.bf16.msra.mxu1 %v924_v9  ;;  %v260_v2 = vld [vmem:[#allocation2 + $0x58] sm:$0xff] }
  0x19   : > { %820 = vmatprep.subr.bf16.mxu0 %v925_v10  ;;  %879 = vmatprep.subr.bf16.mxu1 %v925_v10 }
  0x1c   : > { %821 = vmatpush3.bf16.msra.mxu0 %v926_v13  ;;  %887 = vmatpush3.bf16.msra.mxu1 %v926_v13 }
  0x1d   : > { %822 = vmatprep.subr.bf16.mxu0 %v927_v14  ;;  %880 = vmatprep.subr.bf16.mxu1 %v927_v14 }
  0x20   : > { %823 = vmatpush3.bf16.msra.mxu0 %v928_v15  ;;  %888 = vmatpush3.bf16.msra.mxu1 %v928_v15 }
  0x21   : > { %824 = vmatprep.subr.bf16.mxu0 %v929_v16  ;;  %881 = vmatprep.subr.bf16.mxu1 %v929_v16 }
  0x24   : > { %825 = vmatpush3.bf16.msra.mxu0 %v930_v17  ;;  %889 = vmatpush3.bf16.msra.mxu1 %v930_v17 }
  0x27   : > { %522 = vmatmul.mubr.bf16.vlgmr.msra.gmra.mrb[0].mxu0 %v931_v18  ;;  %554 = vmatmul.mubr.bf16.vlgmr.msra.gmra.mrb[0].mxu1 %v934_v19 }
  0x28   : > { %529 = vmatprep.mubr.bf16.mxu0 %v937_v20  ;;  %561 = vmatprep.mubr.bf16.mxu1 %v939_v21  ;;  %v253_v20 = vld [vmem:[#allocation2 + $0x20] sm:$0xff] }
  0x2f   : > { %530 = vmatmul.mubr.bf16.gmra.mrb[4].mxu0 %v941_v22  ;;  %562 = vmatmul.mubr.bf16.gmra.mrb[4].mxu1 %v942_v23  ;;  %v261_v22 = vld [vmem:[#allocation2 + $0x60] sm:$0xff] }
  0x30   : > { %537 = vmatprep.mubr.bf16.mxu0 %v943_v24  ;;  %569 = vmatprep.mubr.bf16.mxu1 %v945_v25 }
  0x37   : > { %538 = vmatmul.mubr.bf16.gmra.mrb[8].mxu0 %v947_v26  ;;  %570 = vmatmul.mubr.bf16.gmra.mrb[8].mxu1 %v948_v27 }
  0x38   : > { %545 = vmatprep.mubr.bf16.mxu0 %v949_v28  ;;  %577 = vmatprep.mubr.bf16.mxu1 %v951_v29  ;;  %v254_v28 = vld [vmem:[#allocation2 + $0x28] sm:$0xff] }
  0x3f   : > { %546 = vmatmul.mubr.bf16.gmra.mrb[12].mxu0 %v953_v30  ;;  %578 = vmatmul.mubr.bf16.gmra.mrb[12].mxu1 %v954_v31  ;;  %v262_v30 = vld [vmem:[#allocation2 + $0x68] sm:$0xff] }
  0xfa   : > { %v826_v33 = vpop.f32.mrb[0].mxu0  ;;  %v850_v34 = vpop.f32.mrb[0].mxu1 }
  0xfb   : > { %v827_v36 = vpop.f32.mrb[1].mxu0  ;;  %v851_v38 = vpop.f32.mrb[1].mxu1 }
  0xfc   : > { %v828_v39 = vadd.f32 %v827_v36, %v826_v33  ;;  %v852_v40 = vadd.f32 %v851_v38, %v850_v34  ;;  %v829_v41 = vpop.f32.mrb[2].mxu0  ;;  %v853_v42 = vpop.f32.mrb[2].mxu1 }
  0xfd   : > { %v830_v44 = vpop.f32.mrb[3].mxu0  ;;  %v854_v46 = vpop.f32.mrb[3].mxu1 }
  0xfe   : > { %v586_v47 = vadd.f32 %v828_v39, %v249_v35  ;;  %v594_v48 = vadd.f32 %v852_v40, %v257_v37  ;;  %v831_v49 = vadd.f32 %v830_v44, %v829_v41  ;;  %v855_v50 = vadd.f32 %v854_v46, %v853_v42 }
 0x100   : > { %603 = vst.msk [vmem:[#allocation2] sm:$0xff] %vm232_vm0, %v586_v47  ;;  %611 = vst.msk [vmem:[#allocation2 + $0x40] sm:$0xff] %vm232_vm0, %v594_v48  ;;  %v587_v51 = vadd.f32 %v831_v49, %v250_v43  ;;  %v595_v52 = vadd.f32 %v855_v50, %v258_v45  ;;  %v255_v48 = vld [vmem:[#allocation2 + $0x30] sm:$0xff] }
 0x101   : > { %v263_v50 = vld [vmem:[#allocation2 + $0x70] sm:$0xff] }
 0x102   : > { %604 = vst.msk [vmem:[#allocation2 + $0x8] sm:$0xff] %vm232_vm0, %v587_v51  ;;  %612 = vst.msk [vmem:[#allocation2 + $0x48] sm:$0xff] %vm232_vm0, %v595_v52  ;;  %v832_v53 = vpop.f32.mrb[4].mxu0  ;;  %v856_v54 = vpop.f32.mrb[4].mxu1 }
 0x103   : > { %v833_v56 = vpop.f32.mrb[5].mxu0  ;;  %v857_v58 = vpop.f32.mrb[5].mxu1 }
 0x104   : > { %v834_v59 = vadd.f32 %v833_v56, %v832_v53  ;;  %v858_v60 = vadd.f32 %v857_v58, %v856_v54  ;;  %v835_v61 = vpop.f32.mrb[6].mxu0  ;;  %v859_v62 = vpop.f32.mrb[6].mxu1  ;;  %v256_v56 = vld [vmem:[#allocation2 + $0x38] sm:$0xff] }
 0x105   : > { %v836_v1 = vpop.f32.mrb[7].mxu0  ;;  %v860_v3 = vpop.f32.mrb[7].mxu1  ;;  %v264_v58 = vld [vmem:[#allocation2 + $0x78] sm:$0xff] }
 0x106   : > { %v588_v4 = vadd.f32 %v834_v59, %v251_v55  ;;  %v596_v5 = vadd.f32 %v858_v60, %v259_v57  ;;  %v837_v6 = vadd.f32 %v836_v1, %v835_v61  ;;  %v861_v7 = vadd.f32 %v860_v3, %v859_v62 }
 0x107   : > { %v622_v8 = vld [vmem:[#allocation2] sm:$0xff] }
 0x108   : > { %v630_v9 = vld [vmem:[#allocation2 + $0x40] sm:$0xff]  ;;  %v645_v10 = vadd.f32 %v1115_v63, %v622_v8  ;;  %605 = vst.msk [vmem:[#allocation2 + $0x10] sm:$0xff] %vm232_vm0, %v588_v4  ;;  %613 = vst.msk [vmem:[#allocation2 + $0x50] sm:$0xff] %vm232_vm0, %v596_v5  ;;  %v589_v12 = vadd.f32 %v837_v6, %v252_v0  ;;  %v597_v13 = vadd.f32 %v861_v7, %v260_v2 }
 0x109   : > { %v653_v11 = vadd.f32 %v1115_v63, %v630_v9  ;;  %v623_v14 = vld [vmem:[#allocation2 + $0x8] sm:$0xff] }
 0x10a   : > { %v631_v15 = vld [vmem:[#allocation2 + $0x48] sm:$0xff]  ;;  %661 = vst.msk [vmem:[%s1122_s8] sm:$0xff] %vm232_vm0, %v645_v10  ;;  %v646_v16 = vadd.f32 %v1115_v63, %v623_v14  ;;  %606 = vst.msk [vmem:[#allocation2 + $0x18] sm:$0xff] %vm232_vm0, %v589_v12  ;;  %v838_v18 = vpop.f32.mrb[8].mxu0  ;;  %v862_v19 = vpop.f32.mrb[8].mxu1 }
 0x10b   : > { %669 = vst.msk [vmem:[%s1122_s8 + $0x40] sm:$0xff] %vm232_vm0, %v653_v11  ;;  %v654_v17 = vadd.f32 %v1115_v63, %v631_v15  ;;  %614 = vst.msk [vmem:[#allocation2 + $0x58] sm:$0xff] %vm232_vm0, %v597_v13  ;;  %v839_v21 = vpop.f32.mrb[9].mxu0  ;;  %v863_v23 = vpop.f32.mrb[9].mxu1 }
 0x10c   : > { %662 = vst.msk [vmem:[%s1122_s8 + $0x8] sm:$0xff] %vm232_vm0, %v646_v16  ;;  %v840_v24 = vadd.f32 %v839_v21, %v838_v18  ;;  %v864_v25 = vadd.f32 %v863_v23, %v862_v19  ;;  %v841_v26 = vpop.f32.mrb[10].mxu0  ;;  %v865_v27 = vpop.f32.mrb[10].mxu1 }
 0x10d   : > { %670 = vst.msk [vmem:[%s1122_s8 + $0x48] sm:$0xff] %vm232_vm0, %v654_v17  ;;  %v842_v29 = vpop.f32.mrb[11].mxu0  ;;  %v866_v31 = vpop.f32.mrb[11].mxu1 }
 0x10e   : > { %v590_v32 = vadd.f32 %v840_v24, %v253_v20  ;;  %v598_v33 = vadd.f32 %v864_v25, %v261_v22  ;;  %v843_v34 = vadd.f32 %v842_v29, %v841_v26  ;;  %v867_v35 = vadd.f32 %v866_v31, %v865_v27 }
 0x10f   : > { %v624_v36 = vld [vmem:[#allocation2 + $0x10] sm:$0xff] }
 0x110   : > { %v632_v37 = vld [vmem:[#allocation2 + $0x50] sm:$0xff]  ;;  %v647_v38 = vadd.f32 %v1115_v63, %v624_v36  ;;  %607 = vst.msk [vmem:[#allocation2 + $0x20] sm:$0xff] %vm232_vm0, %v590_v32  ;;  %615 = vst.msk [vmem:[#allocation2 + $0x60] sm:$0xff] %vm232_vm0, %v598_v33  ;;  %v591_v40 = vadd.f32 %v843_v34, %v254_v28  ;;  %v599_v41 = vadd.f32 %v867_v35, %v262_v30 }
 0x111   : > { %v655_v39 = vadd.f32 %v1115_v63, %v632_v37  ;;  %v625_v42 = vld [vmem:[#allocation2 + $0x18] sm:$0xff] }
 0x112   : > { %v633_v43 = vld [vmem:[#allocation2 + $0x58] sm:$0xff]  ;;  %663 = vst.msk [vmem:[%s1122_s8 + $0x10] sm:$0xff] %vm232_vm0, %v647_v38  ;;  %v648_v44 = vadd.f32 %v1115_v63, %v625_v42  ;;  %608 = vst.msk [vmem:[#allocation2 + $0x28] sm:$0xff] %vm232_vm0, %v591_v40  ;;  %v844_v46 = vpop.f32.mrb[12].mxu0  ;;  %v868_v47 = vpop.f32.mrb[12].mxu1 }
 0x113   : > { %671 = vst.msk [vmem:[%s1122_s8 + $0x50] sm:$0xff] %vm232_vm0, %v655_v39  ;;  %v656_v45 = vadd.f32 %v1115_v63, %v633_v43  ;;  %616 = vst.msk [vmem:[#allocation2 + $0x68] sm:$0xff] %vm232_vm0, %v599_v41  ;;  %v845_v49 = vpop.f32.mrb[13].mxu0  ;;  %v869_v51 = vpop.f32.mrb[13].mxu1 }
 0x114   : > { %664 = vst.msk [vmem:[%s1122_s8 + $0x18] sm:$0xff] %vm232_vm0, %v648_v44  ;;  %v846_v52 = vadd.f32 %v845_v49, %v844_v46  ;;  %v870_v53 = vadd.f32 %v869_v51, %v868_v47  ;;  %v847_v54 = vpop.f32.mrb[14].mxu0  ;;  %v871_v55 = vpop.f32.mrb[14].mxu1 }
 0x115   : > { %672 = vst.msk [vmem:[%s1122_s8 + $0x58] sm:$0xff] %vm232_vm0, %v656_v45  ;;  %v848_v57 = vpop.f32.mrb[15].mxu0  ;;  %v872_v59 = vpop.f32.mrb[15].mxu1 }
 0x116   : > { %v592_v60 = vadd.f32 %v846_v52, %v255_v48  ;;  %v600_v61 = vadd.f32 %v870_v53, %v263_v50  ;;  %v849_v62 = vadd.f32 %v848_v57, %v847_v54  ;;  %v873_v0 = vadd.f32 %v872_v59, %v871_v55 }
 0x117   : > { %v626_v1 = vld [vmem:[#allocation2 + $0x20] sm:$0xff] }
 0x118   : > { %v634_v2 = vld [vmem:[#allocation2 + $0x60] sm:$0xff]  ;;  %v649_v3 = vadd.f32 %v1115_v63, %v626_v1  ;;  %609 = vst.msk [vmem:[#allocation2 + $0x30] sm:$0xff] %vm232_vm0, %v592_v60  ;;  %617 = vst.msk [vmem:[#allocation2 + $0x70] sm:$0xff] %vm232_vm0, %v600_v61  ;;  %v593_v5 = vadd.f32 %v849_v62, %v256_v56  ;;  %v601_v6 = vadd.f32 %v873_v0, %v264_v58 }
 0x119   : > { %v657_v4 = vadd.f32 %v1115_v63, %v634_v2  ;;  %v627_v7 = vld [vmem:[#allocation2 + $0x28] sm:$0xff] }
 0x11a   : > { %v635_v8 = vld [vmem:[#allocation2 + $0x68] sm:$0xff]  ;;  %665 = vst.msk [vmem:[%s1122_s8 + $0x20] sm:$0xff] %vm232_vm0, %v649_v3  ;;  %v650_v9 = vadd.f32 %v1115_v63, %v627_v7  ;;  %610 = vst.msk [vmem:[#allocation2 + $0x38] sm:$0xff] %vm232_vm0, %v593_v5 }
 0x11b   : > { %673 = vst.msk [vmem:[%s1122_s8 + $0x60] sm:$0xff] %vm232_vm0, %v657_v4  ;;  %v658_v10 = vadd.f32 %v1115_v63, %v635_v8  ;;  %618 = vst.msk [vmem:[#allocation2 + $0x78] sm:$0xff] %vm232_vm0, %v601_v6 }
 0x11c   : > { %666 = vst.msk [vmem:[%s1122_s8 + $0x28] sm:$0xff] %vm232_vm0, %v650_v9 }
 0x11d   : > { %674 = vst.msk [vmem:[%s1122_s8 + $0x68] sm:$0xff] %vm232_vm0, %v658_v10 }
 0x11f   : > { %v628_v11 = vld [vmem:[#allocation2 + $0x30] sm:$0xff] }
 0x120   : > { %v636_v12 = vld [vmem:[#allocation2 + $0x70] sm:$0xff]  ;;  %v651_v13 = vadd.f32 %v1115_v63, %v628_v11 }
 0x121   : > { %v659_v14 = vadd.f32 %v1115_v63, %v636_v12  ;;  %v629_v15 = vld [vmem:[#allocation2 + $0x38] sm:$0xff] }
 0x122   : > { %v637_v16 = vld [vmem:[#allocation2 + $0x78] sm:$0xff]  ;;  %667 = vst.msk [vmem:[%s1122_s8 + $0x30] sm:$0xff] %vm232_vm0, %v651_v13  ;;  %v652_v17 = vadd.f32 %v1115_v63, %v629_v15 }
 0x123   : > { %675 = vst.msk [vmem:[%s1122_s8 + $0x70] sm:$0xff] %vm232_vm0, %v659_v14  ;;  %v660_v18 = vadd.f32 %v1115_v63, %v637_v16 }
 0x124   : > { %668 = vst.msk [vmem:[%s1122_s8 + $0x38] sm:$0xff] %vm232_vm0, %v652_v17 }
 0x125   : > { %676 = vst.msk [vmem:[%s1122_s8 + $0x78] sm:$0xff] %vm232_vm0, %v660_v18 }
 0x126 PF: > { %s13_s14 = sadd.s32 1, %s977_s14   ;;  %s1197_s12 = smov %s973_s13 }
 0x127   : > { %p10_p5 = scmp.ge.s32.totalorder %s13_s14, 4   ;;  %s1198_s13 = smov %s1200_s15 }
 0x129   :  { %12 = sbr.rel (!%p10_p5) target bundleno = 2 (0x2), region = 73 }

// kernel: vgae_encoder_pallas.2
= control target key start
LH: loop header
LB: loop body
LE: loop exit
PB: predicated region body
PF: predicated region fallthrough
CT: control target
= control target key end

     0   :  { %s1586_s18 = smov 0   ;;  %s1588_s19 = smov 0   ;;  %s1788_s0 = inlined_call_operand.vmem [shape: bf16[256,256], index: 0, kind: input, shape index: {}]   ;;  %s1789_s1 = inlined_call_operand.vmem [shape: bf16[256,16], index: 1, kind: input, shape index: {}]   ;;  %s1790_s2 = inlined_call_operand.vmem [shape: bf16[16,16], index: 2, kind: input, shape index: {}]   ;;  %s1791_s3 = inlined_call_operand.vmem [shape: f32[1,16], index: 3, kind: input, shape index: {}]   ;;  %s1792_s4 = inlined_call_operand.vmem [shape: bf16[16,16], index: 4, kind: input, shape index: {}]   ;;  %s1793_s5 = inlined_call_operand.vmem [shape: bf16[256,16], index: 5, kind: output, shape index: {}]  }
   0x1   :  { %s1590_s20 = smov 0  }
   0x2 LB: > { %s27_s21 = sadd.s32 1, %s1549_s19  ;;  %p1221_p0 = scmp.ge.s32.totalorder %s1553_s20, 1  ;;  %s1553_s20 = sphi %s1590_s20, %s15_s20   ;;  %s1549_s19 = sphi %s1588_s19, %s1795_s19   ;;  %s1545_s18 = sphi %s1586_s18, %s1794_s18  }
   0x3   : > { %p29_p1 = scmp.ge.s32.totalorder %s27_s21, 2  ;;  %p219_p2 = scmp.lt.s32.totalorder %s1553_s20, 3 }
   0x5   : > { %s1797_s21 = smov (%p29_p1, %s27_s21), 0  ;;  %p220_p3 = pnand %p1221_p0, %p219_p2 }
   0x6   : > { %v1490_v0 = vld [vmem:[%s1789_s1 + $0x40] sm:$0xff] (!%p220_p3)   ;;  %s1222_s24 = sshll.u32 (!%p220_p3), %s1545_s18, 4  ;;  %v1492_v2 = vld [vmem:[%s1789_s1 + $0x48] sm:$0xff] (!%p220_p3)   ;;  %v1494_v4 = vld [vmem:[%s1789_s1 + $0x50] sm:$0xff] (!%p220_p3)   ;;  %vm286_vm0 = vcmask (!%p220_p3), 130048   ;;  %v1555_v32 = vmov (!%p220_p3), 0.0  }
   0x7   : > { %223 = sbr.rel (%p220_p3) target bundleno = 759 (0x2f7), region = 40  ;;  %v1491_v1 = vld [vmem:[%s1789_s1] sm:$0xff] (!%p220_p3)   ;;  %1324 = vmatprep.subr.bf16.mxu0 (!%p220_p3), %v1490_v0  ;;  %v1493_v3 = vld [vmem:[%s1789_s1 + $0x8] sm:$0xff] (!%p220_p3)   ;;  %p259_p4 = scmp.lt.s32.totalorder (!%p220_p3), %s1222_s24, 31  ;;  %v1495_v5 = vld [vmem:[%s1789_s1 + $0x10] sm:$0xff] (!%p220_p3)   ;;  %287 = vst.msk [vmem:[#allocation2] sm:$0xff] (!%p220_p3), %vm286_vm0, %v1555_v32 }
   0x8   : > { %1325 = vmatpush3.bf16.msra.mxu0 (!%p220_p3), %v1491_v1  ;;  %v1496_v6 = vld [vmem:[%s1789_s1 + $0x58] sm:$0xff] (!%p220_p3)   ;;  %v1498_v8 = vld [vmem:[%s1789_s1 + $0x60] sm:$0xff] (!%p220_p3)   ;;  %v1500_v10 = vld [vmem:[%s1789_s1 + $0x68] sm:$0xff] (!%p220_p3)   ;;  %288 = vst.msk [vmem:[#allocation2 + $0x8] sm:$0xff] (!%p220_p3), %vm286_vm0, %v1555_v32  ;;  %vm1113_vm1 = vcmask (!%p220_p3), 125952  }
   0x9   : > { %1326 = vmatprep.subr.bf16.mxu0 (!%p220_p3), %v1492_v2  ;;  %v1497_v7 = vld [vmem:[%s1789_s1 + $0x18] sm:$0xff] (!%p220_p3)   ;;  %v1499_v9 = vld [vmem:[%s1789_s1 + $0x20] sm:$0xff] (!%p220_p3)   ;;  %v1501_v12 = vld [vmem:[%s1789_s1 + $0x28] sm:$0xff] (!%p220_p3)   ;;  %289 = vst.msk [vmem:[#allocation2 + $0x10] sm:$0xff] (!%p220_p3), %vm286_vm0, %v1555_v32 }
   0xa   : > { %v1502_v13 = vld [vmem:[%s1789_s1 + $0x70] sm:$0xff] (!%p220_p3)   ;;  %v1504_v15 = vld [vmem:[%s1789_s1 + $0x78] sm:$0xff] (!%p220_p3)   ;;  %290 = vst.msk [vmem:[#allocation2 + $0x18] sm:$0xff] (!%p220_p3), %vm286_vm0, %v1555_v32  ;;  %291 = vst.msk [vmem:[#allocation2 + $0x20] sm:$0xff] (!%p220_p3), %vm286_vm0, %v1555_v32 }
   0xb   : > { %v1503_v14 = vld [vmem:[%s1789_s1 + $0x30] sm:$0xff] (!%p220_p3)   ;;  %v1505_v16 = vld [vmem:[%s1789_s1 + $0x38] sm:$0xff] (!%p220_p3)   ;;  %292 = vst.msk [vmem:[#allocation2 + $0x28] sm:$0xff] (!%p220_p3), %vm286_vm0, %v1555_v32  ;;  %293 = vst.msk [vmem:[#allocation2 + $0x30] sm:$0xff] (!%p220_p3), %vm286_vm0, %v1555_v32 }
   0xc   : > { %1327 = vmatpush3.bf16.msra.mxu0 (!%p220_p3), %v1493_v3  ;;  %294 = vst.msk [vmem:[#allocation2 + $0x38] sm:$0xff] (!%p220_p3), %vm286_vm0, %v1555_v32  ;;  %295 = vst.msk [vmem:[#allocation2 + $0x40] sm:$0xff] (!%p220_p3), %vm286_vm0, %v1555_v32  ;;  %v1321_v33 = vld [vmem:[%s1790_s2] sm:$0xff] (!%p220_p3)  }
   0xd   : > { %1328 = vmatprep.subr.bf16.mxu0 (!%p220_p3), %v1494_v4  ;;  %296 = vst.msk [vmem:[#allocation2 + $0x48] sm:$0xff] (!%p220_p3), %vm286_vm0, %v1555_v32  ;;  %297 = vst.msk [vmem:[#allocation2 + $0x50] sm:$0xff] (!%p220_p3), %vm286_vm0, %v1555_v32  ;;  %1462 = vmatprep.subr.bf16.mxu1 (!%p220_p3), %v1321_v33 }
   0xe   : > { %s1799_s24 = smov (!%p259_p4, %s1222_s24), 31  ;;  %298 = vst.msk [vmem:[#allocation2 + $0x58] sm:$0xff] %vm286_vm0, %v1555_v32  ;;  %299 = vst.msk [vmem:[#allocation2 + $0x60] sm:$0xff] %vm286_vm0, %v1555_v32  ;;  %1464 = vmatpush3.bf16.msra.mxu1 %v1321_v33  ;;  %v303_v35 = vld [vmem:[#allocation2] sm:$0xff] }
   0xf   : > { %s1303_s14 = sshll.u32 %s1799_s24, 3  ;;  %300 = vst.msk [vmem:[#allocation2 + $0x68] sm:$0xff] %vm286_vm0, %v1555_v32  ;;  %301 = vst.msk [vmem:[#allocation2 + $0x70] sm:$0xff] %vm286_vm0, %v1555_v32  ;;  %v304_v39 = vld [vmem:[#allocation2 + $0x8] sm:$0xff] }
  0x10   : > { %1329 = vmatpush3.bf16.msra.mxu0 %v1495_v5  ;;  %s1637_s22 = scalar_lea.vmem %s1788_s0, %s1303_s14  ;;  %302 = vst.msk [vmem:[#allocation2 + $0x78] sm:$0xff] %vm286_vm0, %v1555_v32  ;;  %v305_v45 = vld [vmem:[#allocation2 + $0x10] sm:$0xff] }
  0x11   : > { %1330 = vmatprep.subr.bf16.mxu0 %v1496_v6  ;;  %v1508_v11 = vld [vmem:[%s1637_s22 + $0x4] ss:$8 sps:$4 sm:$0xff]   ;;  %v1506_v17 = vld [vmem:[%s1637_s22] ss:$8 sps:$4 sm:$0xff]   ;;  %v1509_v18 = vld [vmem:[%s1637_s22 + $0x14] ss:$8 sps:$4 sm:$0xff]  }
  0x12   : > { %575 = vmatprep.mubr.bf16.mxu0 %v1508_v11  ;;  %v1511_v19 = vld [vmem:[%s1637_s22 + $0x10] ss:$8 sps:$4 sm:$0xff]   ;;  %v1512_v20 = vld [vmem:[%s1637_s22 + $0x24] ss:$8 sps:$4 sm:$0xff]   ;;  %v1514_v21 = vld [vmem:[%s1637_s22 + $0x20] ss:$8 sps:$4 sm:$0xff]  }
  0x13   : > { %v1515_v22 = vld [vmem:[%s1637_s22 + $0x34] ss:$8 sps:$4 sm:$0xff]   ;;  %v1517_v23 = vld [vmem:[%s1637_s22 + $0x30] ss:$8 sps:$4 sm:$0xff]   ;;  %v1518_v24 = vld [vmem:[%s1637_s22 + $0x44] ss:$8 sps:$4 sm:$0xff]  }
  0x14   : > { %1331 = vmatpush3.bf16.msra.mxu0 %v1497_v7  ;;  %v1520_v25 = vld [vmem:[%s1637_s22 + $0x40] ss:$8 sps:$4 sm:$0xff]   ;;  %v1521_v26 = vld [vmem:[%s1637_s22 + $0x54] ss:$8 sps:$4 sm:$0xff]   ;;  %v1523_v27 = vld [vmem:[%s1637_s22 + $0x50] ss:$8 sps:$4 sm:$0xff]  }
  0x15   : > { %1332 = vmatprep.subr.bf16.mxu0 %v1498_v8  ;;  %v1524_v28 = vld [vmem:[%s1637_s22 + $0x64] ss:$8 sps:$4 sm:$0xff]   ;;  %v1526_v29 = vld [vmem:[%s1637_s22 + $0x60] ss:$8 sps:$4 sm:$0xff]   ;;  %v1527_v30 = vld [vmem:[%s1637_s22 + $0x74] ss:$8 sps:$4 sm:$0xff]  }
  0x16   : > { %v1529_v31 = vld [vmem:[%s1637_s22 + $0x70] ss:$8 sps:$4 sm:$0xff]   ;;  %v307_v57 = vld [vmem:[#allocation2 + $0x20] sm:$0xff]  ;;  %v308_v61 = vld [vmem:[#allocation2 + $0x28] sm:$0xff]  ;;  %s1226_s22 = sshll.u32 %s1799_s24, 2 }
  0x17   : > { %v306_v49 = vld [vmem:[#allocation2 + $0x18] sm:$0xff]  ;;  %v309_v5 = vld [vmem:[#allocation2 + $0x30] sm:$0xff]  ;;  %s1745_s26 = scalar_lea.vmem %s1793_s5, %s1226_s22 }
  0x18   : > { %1333 = vmatpush3.bf16.msra.mxu0 %v1499_v9  ;;  %v310_v9 = vld [vmem:[#allocation2 + $0x38] sm:$0xff] }
  0x19   : > { %1334 = vmatprep.subr.bf16.mxu0 %v1500_v10  ;;  %v314_v33 = vld [vmem:[#allocation2 + $0x58] sm:$0xff] }
  0x1c   : > { %1335 = vmatpush3.bf16.msra.mxu0 %v1501_v12 }
  0x1d   : > { %1336 = vmatprep.subr.bf16.mxu0 %v1502_v13 }
  0x20   : > { %1337 = vmatpush3.bf16.msra.mxu0 %v1503_v14 }
  0x21   : > { %1338 = vmatprep.subr.bf16.mxu0 %v1504_v15 }
  0x24   : > { %1339 = vmatpush3.bf16.msra.mxu0 %v1505_v16 }
  0x27   : > { %576 = vmatmul.mubr.bf16.vlgmr.msra.gmra.mrb[0].mxu0 %v1506_v17  ;;  %v311_v17 = vld [vmem:[#allocation2 + $0x40] sm:$0xff] }
  0x28   : > { %583 = vmatprep.mubr.bf16.mxu0 %v1509_v18 }
  0x2f   : > { %584 = vmatmul.mubr.bf16.gmra.mrb[4].mxu0 %v1511_v19 }
  0x30   : > { %591 = vmatprep.mubr.bf16.mxu0 %v1512_v20 }
  0x37   : > { %592 = vmatmul.mubr.bf16.gmra.mrb[8].mxu0 %v1514_v21  ;;  %v312_v21 = vld [vmem:[#allocation2 + $0x48] sm:$0xff] }
  0x38   : > { %599 = vmatprep.mubr.bf16.mxu0 %v1515_v22 }
  0x3f   : > { %600 = vmatmul.mubr.bf16.gmra.mrb[12].mxu0 %v1517_v23 }
  0x40   : > { %607 = vmatprep.mubr.bf16.mxu0 %v1518_v24 }
  0x47   : > { %608 = vmatmul.mubr.bf16.gmra.mrb[16].mxu0 %v1520_v25 }
  0x48   : > { %615 = vmatprep.mubr.bf16.mxu0 %v1521_v26 }
  0x4f   : > { %616 = vmatmul.mubr.bf16.gmra.mrb[20].mxu0 %v1523_v27 }
  0x50   : > { %623 = vmatprep.mubr.bf16.mxu0 %v1524_v28 }
  0x57   : > { %624 = vmatmul.mubr.bf16.gmra.mrb[24].mxu0 %v1526_v29  ;;  %v313_v29 = vld [vmem:[#allocation2 + $0x50] sm:$0xff] }
  0x58   : > { %631 = vmatprep.mubr.bf16.mxu0 %v1527_v30 }
  0x5f   : > { %632 = vmatmul.mubr.bf16.gmra.mrb[28].mxu0 %v1529_v31 }
  0xfa   : > { %v1340_v34 = vpop.f32.mrb[0].mxu0 }
  0xfb   : > { %v1341_v36 = vpop.f32.mrb[1].mxu0 }
  0xfc   : > { %v1342_v37 = vadd.f32 %v1341_v36, %v1340_v34  ;;  %v1343_v38 = vpop.f32.mrb[2].mxu0 }
  0xfd   : > { %v1344_v40 = vpop.f32.mrb[3].mxu0 }
  0xfe   : > { %v640_v41 = vadd.f32 %v1342_v37, %v303_v35  ;;  %v1345_v42 = vadd.f32 %v1344_v40, %v1343_v38 }
 0x100   : > { %657 = vst.msk [vmem:[#allocation2] sm:$0xff] %vm286_vm0, %v640_v41  ;;  %v641_v43 = vadd.f32 %v1345_v42, %v304_v39  ;;  %v315_v41 = vld [vmem:[#allocation2 + $0x60] sm:$0xff] }
 0x102   : > { %658 = vst.msk [vmem:[#allocation2 + $0x8] sm:$0xff] %vm286_vm0, %v641_v43  ;;  %v1346_v44 = vpop.f32.mrb[4].mxu0 }
 0x103   : > { %v1347_v46 = vpop.f32.mrb[5].mxu0 }
 0x104   : > { %v1348_v47 = vadd.f32 %v1347_v46, %v1346_v44  ;;  %v1349_v48 = vpop.f32.mrb[6].mxu0 }
 0x105   : > { %v1350_v50 = vpop.f32.mrb[7].mxu0 }
 0x106   : > { %v642_v51 = vadd.f32 %v1348_v47, %v305_v45  ;;  %v1351_v52 = vadd.f32 %v1350_v50, %v1349_v48  ;;  %v316_v45 = vld [vmem:[#allocation2 + $0x68] sm:$0xff] }
 0x107   : > { %v676_v53 = vld [vmem:[#allocation2] sm:$0xff] }
 0x108   : > { %659 = vst.msk [vmem:[#allocation2 + $0x10] sm:$0xff] %vm286_vm0, %v642_v51  ;;  %v643_v54 = vadd.f32 %v1351_v52, %v306_v49  ;;  %1419 = vmatprep.mubr.msk.f32.mxu1 %vm286_vm0, %v676_v53  ;;  %v317_v53 = vld [vmem:[#allocation2 + $0x70] sm:$0xff] }
 0x109   : > { %v677_v55 = vld [vmem:[#allocation2 + $0x8] sm:$0xff] }
 0x10a   : > { %660 = vst.msk [vmem:[#allocation2 + $0x18] sm:$0xff] %vm286_vm0, %v643_v54  ;;  %v1352_v56 = vpop.f32.mrb[8].mxu0  ;;  %1420 = vmatmul.mubr.msk.f32.vlgmr.msra.gmra.mrb[0].mxu1 %vm286_vm0, %v677_v55 }
 0x10b   : > { %v1353_v58 = vpop.f32.mrb[9].mxu0 }
 0x10c   : > { %v1354_v59 = vadd.f32 %v1353_v58, %v1352_v56  ;;  %v1355_v60 = vpop.f32.mrb[10].mxu0 }
 0x10d   : > { %v1356_v62 = vpop.f32.mrb[11].mxu0 }
 0x10e   : > { %v644_v63 = vadd.f32 %v1354_v59, %v307_v57  ;;  %v1357_v0 = vadd.f32 %v1356_v62, %v1355_v60  ;;  %v318_v57 = vld [vmem:[#allocation2 + $0x78] sm:$0xff] }
 0x10f   : > { %v678_v1 = vld [vmem:[#allocation2 + $0x10] sm:$0xff] }
 0x110   : > { %661 = vst.msk [vmem:[#allocation2 + $0x20] sm:$0xff] %vm286_vm0, %v644_v63  ;;  %v645_v2 = vadd.f32 %v1357_v0, %v308_v61  ;;  %1422 = vmatprep.mubr.msk.f32.mxu1 %vm286_vm0, %v678_v1 }
 0x111   : > { %v679_v3 = vld [vmem:[#allocation2 + $0x18] sm:$0xff] }
 0x112   : > { %662 = vst.msk [vmem:[#allocation2 + $0x28] sm:$0xff] %vm286_vm0, %v645_v2  ;;  %v1358_v4 = vpop.f32.mrb[12].mxu0  ;;  %1423 = vmatmul.mubr.msk.f32.gmra.mrb[2].mxu1 %vm286_vm0, %v679_v3  ;;  %v1530_v2 = vld [vmem:[%s1792_s4] sm:$0xff]  }
 0x113   : > { %v1359_v6 = vpop.f32.mrb[13].mxu0  ;;  %1443 = vmatprep.subr.bf16.mxu1 %v1530_v2  ;;  %v1259_v3 = vld [vmem:[%s1791_s3] ss:$0 sm:$0xff] }
 0x114   : > { %v1360_v7 = vadd.f32 %v1359_v6, %v1358_v4  ;;  %v1361_v8 = vpop.f32.mrb[14].mxu0  ;;  %1444 = vmatpush3.bf16.msra.mxu1 %v1530_v2 }
 0x115   : > { %v1362_v10 = vpop.f32.mrb[15].mxu0 }
 0x116   : > { %v646_v11 = vadd.f32 %v1360_v7, %v309_v5  ;;  %v1363_v12 = vadd.f32 %v1362_v10, %v1361_v8 }
 0x117   : > { %v680_v13 = vld [vmem:[#allocation2 + $0x20] sm:$0xff] }
 0x118   : > { %663 = vst.msk [vmem:[#allocation2 + $0x30] sm:$0xff] %vm286_vm0, %v646_v11  ;;  %v647_v14 = vadd.f32 %v1363_v12, %v310_v9  ;;  %1425 = vmatprep.mubr.msk.f32.mxu1 %vm286_vm0, %v680_v13 }
 0x119   : > { %v681_v15 = vld [vmem:[#allocation2 + $0x28] sm:$0xff] }
 0x11a   : > { %664 = vst.msk [vmem:[#allocation2 + $0x38] sm:$0xff] %vm286_vm0, %v647_v14  ;;  %v1364_v16 = vpop.f32.mrb[16].mxu0  ;;  %1426 = vmatmul.mubr.msk.f32.gmra.mrb[4].mxu1 %vm286_vm0, %v681_v15 }
 0x11b   : > { %v1365_v18 = vpop.f32.mrb[17].mxu0 }
 0x11c   : > { %v1366_v19 = vadd.f32 %v1365_v18, %v1364_v16  ;;  %v1367_v20 = vpop.f32.mrb[18].mxu0 }
 0x11d   : > { %v1368_v22 = vpop.f32.mrb[19].mxu0 }
 0x11e   : > { %v648_v23 = vadd.f32 %v1366_v19, %v311_v17  ;;  %v1369_v24 = vadd.f32 %v1368_v22, %v1367_v20 }
 0x11f   : > { %v682_v25 = vld [vmem:[#allocation2 + $0x30] sm:$0xff] }
 0x120   : > { %665 = vst.msk [vmem:[#allocation2 + $0x40] sm:$0xff] %vm286_vm0, %v648_v23  ;;  %v649_v26 = vadd.f32 %v1369_v24, %v312_v21  ;;  %1428 = vmatprep.mubr.msk.f32.mxu1 %vm286_vm0, %v682_v25 }
 0x121   : > { %v683_v27 = vld [vmem:[#allocation2 + $0x38] sm:$0xff] }
 0x122   : > { %666 = vst.msk [vmem:[#allocation2 + $0x48] sm:$0xff] %vm286_vm0, %v649_v26  ;;  %v1370_v28 = vpop.f32.mrb[20].mxu0  ;;  %1429 = vmatmul.mubr.msk.f32.gmra.mrb[6].mxu1 %vm286_vm0, %v683_v27 }
 0x123   : > { %v1371_v30 = vpop.f32.mrb[21].mxu0 }
 0x124   : > { %v1372_v31 = vadd.f32 %v1371_v30, %v1370_v28  ;;  %v1373_v32 = vpop.f32.mrb[22].mxu0 }
 0x125   : > { %v1374_v34 = vpop.f32.mrb[23].mxu0 }
 0x126   : > { %v650_v35 = vadd.f32 %v1372_v31, %v313_v29  ;;  %v1375_v36 = vadd.f32 %v1374_v34, %v1373_v32 }
 0x127   : > { %v684_v37 = vld [vmem:[#allocation2 + $0x40] sm:$0xff] }
 0x128   : > { %667 = vst.msk [vmem:[#allocation2 + $0x50] sm:$0xff] %vm286_vm0, %v650_v35  ;;  %v651_v38 = vadd.f32 %v1375_v36, %v314_v33  ;;  %1431 = vmatprep.mubr.msk.f32.mxu1 %vm286_vm0, %v684_v37 }
 0x129   : > { %v685_v39 = vld [vmem:[#allocation2 + $0x48] sm:$0xff] }
 0x12a   : > { %668 = vst.msk [vmem:[#allocation2 + $0x58] sm:$0xff] %vm286_vm0, %v651_v38  ;;  %v1376_v40 = vpop.f32.mrb[24].mxu0  ;;  %1432 = vmatmul.mubr.msk.f32.gmra.mrb[8].mxu1 %vm286_vm0, %v685_v39 }
 0x12b   : > { %v1377_v42 = vpop.f32.mrb[25].mxu0 }
 0x12c   : > { %v1378_v43 = vadd.f32 %v1377_v42, %v1376_v40  ;;  %v1379_v44 = vpop.f32.mrb[26].mxu0 }
 0x12d   : > { %v1380_v46 = vpop.f32.mrb[27].mxu0 }
 0x12e   : > { %v652_v47 = vadd.f32 %v1378_v43, %v315_v41  ;;  %v1381_v48 = vadd.f32 %v1380_v46, %v1379_v44 }
 0x12f   : > { %v686_v49 = vld [vmem:[#allocation2 + $0x50] sm:$0xff] }
 0x130   : > { %669 = vst.msk [vmem:[#allocation2 + $0x60] sm:$0xff] %vm286_vm0, %v652_v47  ;;  %v653_v50 = vadd.f32 %v1381_v48, %v316_v45  ;;  %1434 = vmatprep.mubr.msk.f32.mxu1 %vm286_vm0, %v686_v49 }
 0x131   : > { %v687_v51 = vld [vmem:[#allocation2 + $0x58] sm:$0xff] }
 0x132   : > { %670 = vst.msk [vmem:[#allocation2 + $0x68] sm:$0xff] %vm286_vm0, %v653_v50  ;;  %v1382_v52 = vpop.f32.mrb[28].mxu0  ;;  %1435 = vmatmul.mubr.msk.f32.gmra.mrb[10].mxu1 %vm286_vm0, %v687_v51 }
 0x133   : > { %v1383_v54 = vpop.f32.mrb[29].mxu0 }
 0x134   : > { %v1384_v55 = vadd.f32 %v1383_v54, %v1382_v52  ;;  %v1385_v56 = vpop.f32.mrb[30].mxu0 }
 0x135   : > { %v1386_v58 = vpop.f32.mrb[31].mxu0 }
 0x136   : > { %v654_v59 = vadd.f32 %v1384_v55, %v317_v53  ;;  %v1387_v60 = vadd.f32 %v1386_v58, %v1385_v56 }
 0x137   : > { %v688_v61 = vld [vmem:[#allocation2 + $0x60] sm:$0xff] }
 0x138   : > { %671 = vst.msk [vmem:[#allocation2 + $0x70] sm:$0xff] %vm286_vm0, %v654_v59  ;;  %v655_v62 = vadd.f32 %v1387_v60, %v318_v57  ;;  %1437 = vmatprep.mubr.msk.f32.mxu1 %vm286_vm0, %v688_v61 }
 0x139   : > { %v689_v63 = vld [vmem:[#allocation2 + $0x68] sm:$0xff] }
 0x13a   : > { %672 = vst.msk [vmem:[#allocation2 + $0x78] sm:$0xff] %vm286_vm0, %v655_v62  ;;  %1438 = vmatmul.mubr.msk.f32.gmra.mrb[12].mxu1 %vm286_vm0, %v689_v63 }
 0x13f   : > { %v690_v0 = vld [vmem:[#allocation2 + $0x70] sm:$0xff] }
 0x140   : > { %1440 = vmatprep.mubr.msk.f32.mxu1 %vm286_vm0, %v690_v0 }
 0x141   : > { %v691_v1 = vld [vmem:[#allocation2 + $0x78] sm:$0xff] }
 0x142   : > { %1441 = vmatmul.mubr.msk.f32.gmra.mrb[14].mxu1 %vm286_vm0, %v691_v1 }
 0x1dd   : > { %v1421_v4 = vpop.f32.mrb[0].mxu1 }
 0x1de   : > { %v823_v5 = vadd.f32 %v1421_v4, %v1259_v3  ;;  %v817_v6 = vpop.f32.mrb[1].mxu1 }
 0x1df   : > { %v818_v7 = vadd.f32 %v1259_v3, %v817_v6 }
 0x1e0   : > { %v897_v8 = vmax.f32 %v823_v5, 0.0 }
 0x1e1   : > { %v896_v9 = vmax.f32 %v818_v7, 0.0 }
 0x1e3   : > { %v914_v10 = vpack.c.bf16 %v897_v8, %v896_v9 }
 0x1e5   : > { %v1424_v11 = vpop.f32.mrb[2].mxu1  ;;  %1445 = vmatprep.mubr.msk.bf16.mxu1 %vm286_vm0, %v914_v10 }
 0x1e6   : > { %v833_v12 = vadd.f32 %v1424_v11, %v1259_v3  ;;  %v827_v13 = vpop.f32.mrb[3].mxu1 }
 0x1e7   : > { %v828_v14 = vadd.f32 %v1259_v3, %v827_v13 }
 0x1e8   : > { %v899_v15 = vmax.f32 %v833_v12, 0.0 }
 0x1e9   : > { %v898_v16 = vmax.f32 %v828_v14, 0.0 }
 0x1eb   : > { %v915_v17 = vpack.c.bf16 %v899_v15, %v898_v16 }
 0x1ed   : > { %v1427_v18 = vpop.f32.mrb[4].mxu1  ;;  %1446 = vmatmul.mubr.msk.bf16.vlgmr.msra.gmra.mrb[16].mxu1 %vm286_vm0, %v915_v17 }
 0x1ee   : > { %v843_v19 = vadd.f32 %v1427_v18, %v1259_v3  ;;  %v837_v20 = vpop.f32.mrb[5].mxu1 }
 0x1ef   : > { %v838_v21 = vadd.f32 %v1259_v3, %v837_v20 }
 0x1f0   : > { %v901_v22 = vmax.f32 %v843_v19, 0.0 }
 0x1f1   : > { %v900_v23 = vmax.f32 %v838_v21, 0.0 }
 0x1f3   : > { %v916_v24 = vpack.c.bf16 %v901_v22, %v900_v23 }
 0x1f5   : > { %v1430_v25 = vpop.f32.mrb[6].mxu1  ;;  %1449 = vmatprep.mubr.msk.bf16.mxu1 %vm286_vm0, %v916_v24 }
 0x1f6   : > { %v853_v26 = vadd.f32 %v1430_v25, %v1259_v3  ;;  %v847_v27 = vpop.f32.mrb[7].mxu1 }
 0x1f7   : > { %v848_v28 = vadd.f32 %v1259_v3, %v847_v27 }
 0x1f8   : > { %v903_v29 = vmax.f32 %v853_v26, 0.0 }
 0x1f9   : > { %v902_v30 = vmax.f32 %v848_v28, 0.0 }
 0x1fb   : > { %v917_v31 = vpack.c.bf16 %v903_v29, %v902_v30 }
 0x1fd   : > { %v1433_v32 = vpop.f32.mrb[8].mxu1  ;;  %1450 = vmatmul.mubr.msk.bf16.gmra.mrb[20].mxu1 %vm286_vm0, %v917_v31 }
 0x1fe   : > { %v863_v33 = vadd.f32 %v1433_v32, %v1259_v3  ;;  %v857_v34 = vpop.f32.mrb[9].mxu1 }
 0x1ff   : > { %v858_v35 = vadd.f32 %v1259_v3, %v857_v34 }
 0x200   : > { %v905_v36 = vmax.f32 %v863_v33, 0.0 }
 0x201   : > { %v904_v37 = vmax.f32 %v858_v35, 0.0 }
 0x203   : > { %v918_v38 = vpack.c.bf16 %v905_v36, %v904_v37 }
 0x205   : > { %v1436_v39 = vpop.f32.mrb[10].mxu1  ;;  %1453 = vmatprep.mubr.msk.bf16.mxu1 %vm286_vm0, %v918_v38 }
 0x206   : > { %v873_v40 = vadd.f32 %v1436_v39, %v1259_v3  ;;  %v867_v41 = vpop.f32.mrb[11].mxu1 }
 0x207   : > { %v868_v42 = vadd.f32 %v1259_v3, %v867_v41 }
 0x208   : > { %v907_v43 = vmax.f32 %v873_v40, 0.0 }
 0x209   : > { %v906_v44 = vmax.f32 %v868_v42, 0.0 }
 0x20b   : > { %v919_v45 = vpack.c.bf16 %v907_v43, %v906_v44 }
 0x20d   : > { %v1439_v46 = vpop.f32.mrb[12].mxu1  ;;  %1454 = vmatmul.mubr.msk.bf16.gmra.mrb[24].mxu1 %vm286_vm0, %v919_v45 }
 0x20e   : > { %v883_v47 = vadd.f32 %v1439_v46, %v1259_v3  ;;  %v877_v48 = vpop.f32.mrb[13].mxu1 }
 0x20f   : > { %v878_v49 = vadd.f32 %v1259_v3, %v877_v48 }
 0x210   : > { %v909_v50 = vmax.f32 %v883_v47, 0.0 }
 0x211   : > { %v908_v51 = vmax.f32 %v878_v49, 0.0 }
 0x213   : > { %v920_v52 = vpack.c.bf16 %v909_v50, %v908_v51 }
 0x215   : > { %v1442_v53 = vpop.f32.mrb[14].mxu1  ;;  %1457 = vmatprep.mubr.msk.bf16.mxu1 %vm286_vm0, %v920_v52 }
 0x216   : > { %v893_v54 = vadd.f32 %v1442_v53, %v1259_v3  ;;  %v887_v55 = vpop.f32.mrb[15].mxu1 }
 0x217   : > { %v888_v56 = vadd.f32 %v1259_v3, %v887_v55 }
 0x218   : > { %v911_v57 = vmax.f32 %v893_v54, 0.0 }
 0x219   : > { %v910_v58 = vmax.f32 %v888_v56, 0.0 }
 0x21b   : > { %v921_v59 = vpack.c.bf16 %v911_v57, %v910_v58 }
 0x21d   : > { %1458 = vmatmul.mubr.msk.bf16.gmra.mrb[28].mxu1 %vm286_vm0, %v921_v59 }
 0x2c0   : > { %v1447_v60 = vpop.f32.mrb[16].mxu1 }
 0x2c1   : > { %v1306_v61 = vpack.c.bf16 %v1447_v60, %v1447_v60  ;;  %v986_v62 = vpop.f32.mrb[17].mxu1 }
 0x2c2   : > { %v1304_v63 = vpack.c.bf16 %v986_v62, %v986_v62  ;;  %v1448_v0 = vpop.f32.mrb[18].mxu1 }
 0x2c3   : > { %1116 = vst.msk [vmem:[%s1745_s26 + $0x8] sm:$0xf] %vm1113_vm1, %v1306_v61  ;;  %v1307_v1 = vpack.c.bf16 %v1448_v0, %v1448_v0  ;;  %v989_v2 = vpop.f32.mrb[19].mxu1 }
 0x2c4   : > { %1114 = vst.msk [vmem:[%s1745_s26] sm:$0xf] %vm1113_vm1, %v1304_v63  ;;  %v1305_v3 = vpack.c.bf16 %v989_v2, %v989_v2 }
 0x2c5   : > { %1117 = vst.msk [vmem:[%s1745_s26 + $0xc] sm:$0xf] %vm1113_vm1, %v1307_v1 }
 0x2c6   : > { %1115 = vst.msk [vmem:[%s1745_s26 + $0x4] sm:$0xf] %vm1113_vm1, %v1305_v3 }
 0x2d0   : > { %v1451_v4 = vpop.f32.mrb[20].mxu1 }
 0x2d1   : > { %v1310_v5 = vpack.c.bf16 %v1451_v4, %v1451_v4  ;;  %v1002_v6 = vpop.f32.mrb[21].mxu1 }
 0x2d2   : > { %v1308_v7 = vpack.c.bf16 %v1002_v6, %v1002_v6  ;;  %v1452_v8 = vpop.f32.mrb[22].mxu1 }
 0x2d3   : > { %1120 = vst.msk [vmem:[%s1745_s26 + $0x18] sm:$0xf] %vm1113_vm1, %v1310_v5  ;;  %v1311_v9 = vpack.c.bf16 %v1452_v8, %v1452_v8  ;;  %v1005_v10 = vpop.f32.mrb[23].mxu1 }
 0x2d4   : > { %1118 = vst.msk [vmem:[%s1745_s26 + $0x10] sm:$0xf] %vm1113_vm1, %v1308_v7  ;;  %v1309_v11 = vpack.c.bf16 %v1005_v10, %v1005_v10 }
 0x2d5   : > { %1121 = vst.msk [vmem:[%s1745_s26 + $0x1c] sm:$0xf] %vm1113_vm1, %v1311_v9 }
 0x2d6   : > { %1119 = vst.msk [vmem:[%s1745_s26 + $0x14] sm:$0xf] %vm1113_vm1, %v1309_v11 }
 0x2e0   : > { %v1455_v12 = vpop.f32.mrb[24].mxu1 }
 0x2e1   : > { %v1314_v13 = vpack.c.bf16 %v1455_v12, %v1455_v12  ;;  %v1018_v14 = vpop.f32.mrb[25].mxu1 }
 0x2e2   : > { %v1312_v15 = vpack.c.bf16 %v1018_v14, %v1018_v14  ;;  %v1456_v16 = vpop.f32.mrb[26].mxu1 }
 0x2e3   : > { %1124 = vst.msk [vmem:[%s1745_s26 + $0x28] sm:$0xf] %vm1113_vm1, %v1314_v13  ;;  %v1315_v17 = vpack.c.bf16 %v1456_v16, %v1456_v16  ;;  %v1021_v18 = vpop.f32.mrb[27].mxu1 }
 0x2e4   : > { %1122 = vst.msk [vmem:[%s1745_s26 + $0x20] sm:$0xf] %vm1113_vm1, %v1312_v15  ;;  %v1313_v19 = vpack.c.bf16 %v1021_v18, %v1021_v18 }
 0x2e5   : > { %1125 = vst.msk [vmem:[%s1745_s26 + $0x2c] sm:$0xf] %vm1113_vm1, %v1315_v17 }
 0x2e6   : > { %1123 = vst.msk [vmem:[%s1745_s26 + $0x24] sm:$0xf] %vm1113_vm1, %v1313_v19 }
 0x2f0   : > { %v1459_v20 = vpop.f32.mrb[28].mxu1 }
 0x2f1   : > { %v1318_v21 = vpack.c.bf16 %v1459_v20, %v1459_v20  ;;  %v1034_v22 = vpop.f32.mrb[29].mxu1 }
 0x2f2   : > { %v1316_v23 = vpack.c.bf16 %v1034_v22, %v1034_v22  ;;  %v1460_v24 = vpop.f32.mrb[30].mxu1 }
 0x2f3   : > { %1128 = vst.msk [vmem:[%s1745_s26 + $0x38] sm:$0xf] %vm1113_vm1, %v1318_v21  ;;  %v1319_v25 = vpack.c.bf16 %v1460_v24, %v1460_v24  ;;  %v1037_v26 = vpop.f32.mrb[31].mxu1 }
 0x2f4   : > { %1126 = vst.msk [vmem:[%s1745_s26 + $0x30] sm:$0xf] %vm1113_vm1, %v1316_v23  ;;  %v1317_v27 = vpack.c.bf16 %v1037_v26, %v1037_v26 }
 0x2f5   : > { %1129 = vst.msk [vmem:[%s1745_s26 + $0x3c] sm:$0xf] %vm1113_vm1, %v1319_v25 }
 0x2f6   : > { %1127 = vst.msk [vmem:[%s1745_s26 + $0x34] sm:$0xf] %vm1113_vm1, %v1317_v27 }
 0x2f7 PF: > { %s15_s20 = sadd.s32 1, %s1553_s20   ;;  %s1794_s18 = smov %s1549_s19 }
 0x2f8   : > { %p12_p5 = scmp.ge.s32.totalorder %s15_s20, 4   ;;  %s1795_s19 = smov %s1797_s21 }
 0x2fa   :  { %14 = sbr.rel (!%p12_p5) target bundleno = 2 (0x2), region = 81 }

</bundles_post_ra>
